<compile_context>
chip_gen: v5e
topology: v5e:2x2
jax: 0.10.0
libtpu: 0.0.40
codegen_flags: <defaults>
</compile_context>

<pallas_src>
import functools

import jax
import jax.numpy as jnp
from jax.experimental import pallas as pl
from jax.experimental.pallas import tpu as pltpu

BN_EPS = 1e-5
LANE = 128
HID = 16          # hidden width of both BatchNorm'd layers
MAX_TILE = 16384  # lane cap for one streamed block

_VMEM_BUDGET = None


def _vmem_budget_bytes():
    """Per-generation VMEM capacity (64 MiB v7x, 128 MiB v5e/v6e), cached."""
    global _VMEM_BUDGET
    if _VMEM_BUDGET is None:
        try:
            cap = int(pltpu.get_tpu_info().vmem_capacity_bytes)
        except Exception:
            cap = 0
        if cap < 32 * 1024 * 1024:          # query failed / implausible -> v7x-safe default
            cap = 64 * 1024 * 1024
        _VMEM_BUDGET = min(cap, 128 * 1024 * 1024)
    return _VMEM_BUDGET


def _choose_tile(n_input, batch, budget, max_tile):
    """Largest 128-multiple tile whose double-buffered streamed blocks
    (x/out: B rows, w1/w4: HID rows, b4: 1 row, f32) stay within ~1/4 of VMEM."""
    per_lane_bytes = 2 * (batch + 2 * HID + 2) * 4      # 2 = double buffering
    t = (budget // 4) // per_lane_bytes
    t = (t // LANE) * LANE
    t = max(LANE, min(t, MAX_TILE))
    n_up = ((n_input + LANE - 1) // LANE) * LANE
    t = min(t, n_up)
    if max_tile is not None:
        t = max(LANE, min(t, (max_tile // LANE) * LANE))
    return t


# --------------------------------------------------------------------------
# Kernels
# --------------------------------------------------------------------------
def _fused_kernel(x_ref, w1_ref, w23_ref, w4_ref, b4_ref, small_ref, out_ref):
    """Whole forward in one body (everything VMEM-resident).
    small_ref rows: 0=b1, 1=gamma1, 2=beta1, 3=b23, 4=gamma2, 5=beta2."""
    s = small_ref[...]
    h = jnp.dot(x_ref[...], w1_ref[...], preferred_element_type=jnp.float32) + s[0:1]
    mu = jnp.mean(h, axis=0, keepdims=True)
    var = jnp.mean((h - mu) * (h - mu), axis=0, keepdims=True)
    h = jnp.maximum((h - mu) * jax.lax.rsqrt(var + BN_EPS) * s[1:2] + s[2:3], 0.0)
    d = jnp.dot(h, w23_ref[...], preferred_element_type=jnp.float32) + s[3:4]
    mu2 = jnp.mean(d, axis=0, keepdims=True)
    var2 = jnp.mean((d - mu2) * (d - mu2), axis=0, keepdims=True)
    d = jnp.maximum((d - mu2) * jax.lax.rsqrt(var2 + BN_EPS) * s[4:5] + s[5:6], 0.0)
    out_ref[...] = (jnp.dot(d, w4_ref[...], preferred_element_type=jnp.float32)
                    + b4_ref[...]).astype(out_ref.dtype)


def _make_encoder_kernel(tile, kt, ktpc, ncores, n_input):
    """Partial-sum kernel: grid (ncores, ktpc); core c accumulates
    h_partial[c] = sum over its K tiles of x_tile @ w1_tile (f32)."""
    needs_mask = (n_input % tile) != 0       # last K tile is ragged
    has_dup = ncores * ktpc > kt             # last core may get one clamped dup step

    def kernel(x_ref, w1_ref, hpart_ref):
        c = pl.program_id(0)
        k = pl.program_id(1)
        gk = c * ktpc + k

        @pl.when(k == 0)
        def _init():
            hpart_ref[...] = jnp.zeros_like(hpart_ref)

        def _accum():
            xv = x_ref[...]
            wv = w1_ref[...]
            if needs_mask:
                # Zero BOTH x tail columns and w1 tail rows of the ragged last
                # tile (do not rely on garbage*0 -- garbage may be NaN/Inf).
                valid = n_input - gk * tile          # > tile on non-last tiles
                col = jax.lax.broadcasted_iota(jnp.int32, (1, tile), 1)
                row = jax.lax.broadcasted_iota(jnp.int32, (tile, 1), 0)
                xv = jnp.where(col < valid, xv, 0.0)
                wv = jnp.where(row < valid, wv, 0.0)
            hpart_ref[...] += jnp.dot(
                xv, wv, preferred_element_type=jnp.float32)[None]

        if has_dup:
            pl.when(gk < kt)(_accum)         # skip the clamped duplicate tile
        else:
            _accum()

    return kernel


def _decoder_kernel(hpart_ref, small_ref, w23_ref, w4_ref, b4_ref, out_ref):
    """Per N-tile: combine the per-core partial sums, run the tiny 16-wide
    BN/ReLU/fused-middle/BN/ReLU epilogue (recomputed per tile so the grid
    axis stays "parallel" / megacore-safe), then emit one lane-dense tile."""
    s = small_ref[...]
    h = jnp.sum(hpart_ref[...], axis=0) + s[0:1]
    mu = jnp.mean(h, axis=0, keepdims=True)
    var = jnp.mean((h - mu) * (h - mu), axis=0, keepdims=True)
    h = jnp.maximum((h - mu) * jax.lax.rsqrt(var + BN_EPS) * s[1:2] + s[2:3], 0.0)
    d = jnp.dot(h, w23_ref[...], preferred_element_type=jnp.float32) + s[3:4]
    mu2 = jnp.mean(d, axis=0, keepdims=True)
    var2 = jnp.mean((d - mu2) * (d - mu2), axis=0, keepdims=True)
    d = jnp.maximum((d - mu2) * jax.lax.rsqrt(var2 + BN_EPS) * s[4:5] + s[5:6], 0.0)
    out_ref[...] = (jnp.dot(d, w4_ref[...], preferred_element_type=jnp.float32)
                    + b4_ref[...]).astype(out_ref.dtype)


# --------------------------------------------------------------------------
# Wrapper
# --------------------------------------------------------------------------
def prepare_params(params):
    """One-time (per-model) weight preparation, hoisted out of the forward:
    fuse the two middle Linears and pack the six 16-wide vectors."""
    f32 = jnp.float32
    w23 = params["w2"].astype(f32) @ params["w3"].astype(f32)
    b23 = params["b2"].astype(f32) @ params["w3"].astype(f32) + params["b3"].astype(f32)
    small = jnp.concatenate(
        [params["b1"], params["g1"], params["beta1"],
         b23, params["g2"], params["beta2"]], axis=0).astype(f32)   # (6, HID)
    # TODO(synk): optionally store/stream w1/w4 as bfloat16 (f32 MXU accumulation)
    # to halve streamed bytes; kept f32 here to preserve reference tolerances.
    return {"w1": params["w1"].astype(f32), "w4": params["w4"].astype(f32),
            "b4": params["b4"].astype(f32), "w23": w23, "small": small}


@functools.partial(jax.jit, static_argnames=("force_grid", "max_tile"))
def autoencoder_forward(x, prep, force_grid=False, max_tile=None):
    """x: [B, n_input] float32. prep: dict from prepare_params()."""
    B, n_input = x.shape
    f32 = jnp.float32
    x32 = x.astype(f32)
    budget = _vmem_budget_bytes()
    vmem_limit = (budget * 7) // 8          # <=56 MiB on v7x, <=112 MiB on v5e/v6e

    # ---------- fast path: everything VMEM-resident, single fused launch ----
    resident_bytes = (4 * n_input * (2 * B + 2 * HID + 1)
                      + 4 * (8 * B * HID + 8 * HID * HID))
    if (not force_grid) and resident_bytes <= budget // 2:
        return pl.pallas_call(
            _fused_kernel,
            out_shape=jax.ShapeDtypeStruct((B, n_input), x.dtype),
            compiler_params=pltpu.CompilerParams(vmem_limit_bytes=vmem_limit),
        )(x32, prep["w1"], prep["w23"], prep["w4"], prep["b4"], prep["small"])

    # ---------- gridded path (large n_input) ---------------------------------
    tile = _choose_tile(n_input, B, budget, max_tile)
    # Batch is not tiled: (B, tile) blocks plus the (B, HID) epilogue must fit VMEM.
    assert 2 * (B + 2 * HID + 2) * tile * 4 <= budget, (
        "batch too large for un-tiled batch dimension; add batch tiling "
        "with two-pass BatchNorm statistics")

    kt = (n_input + tile - 1) // tile        # K tiles over n_input (encoder)
    ncores = 2 if kt >= 2 else 1             # v7x megacore split of the reduction
    ktpc = (kt + ncores - 1) // ncores
    nt = (n_input + tile - 1) // tile        # N tiles over n_input (decoder)

    # encoder: h_partial[c] = sum_k x[:, k-tile] @ w1[k-tile, :]
    enc_cost = pl.CostEstimate(
        flops=2 * B * n_input * HID, transcendentals=0,
        bytes_accessed=4 * (B * n_input + n_input * HID + ncores * B * HID))
    h_part = pl.pallas_call(
        _make_encoder_kernel(tile, kt, ktpc, ncores, n_input),
        out_shape=jax.ShapeDtypeStruct((ncores, B, HID), f32),
        grid_spec=pltpu.PrefetchScalarGridSpec(
            num_scalar_prefetch=0,
            grid=(ncores, ktpc),
            in_specs=[
                pl.BlockSpec((B, tile),
                             lambda c, k: (0, jnp.minimum(c * ktpc + k, kt - 1))),
                pl.BlockSpec((tile, HID),
                             lambda c, k: (jnp.minimum(c * ktpc + k, kt - 1), 0)),
            ],
            out_specs=pl.BlockSpec((1, B, HID), lambda c, k: (c, 0, 0)),
        ),
        compiler_params=pltpu.CompilerParams(
            dimension_semantics=("parallel", "arbitrary"),
            vmem_limit_bytes=vmem_limit),
        cost_estimate=enc_cost,
    )(x32, prep["w1"])

    # decoder: combine partials + tiny epilogue per tile, stream w4/b4/out over N
    dec_cost = pl.CostEstimate(
        flops=2 * B * HID * n_input + nt * (2 * B * HID * HID),
        transcendentals=nt * 2 * HID,
        bytes_accessed=4 * (HID * n_input + n_input + B * n_input
                            + ncores * B * HID + 7 * HID * HID))
    out = pl.pallas_call(
        _decoder_kernel,
        out_shape=jax.ShapeDtypeStruct((B, n_input), x.dtype),
        grid_spec=pltpu.PrefetchScalarGridSpec(
            num_scalar_prefetch=0,
            grid=(nt,),
            in_specs=[
                pl.BlockSpec((ncores, B, HID), lambda j: (0, 0, 0)),   # resident partials
                pl.BlockSpec((6, HID), lambda j: (0, 0)),              # packed small params
                pl.BlockSpec((HID, HID), lambda j: (0, 0)),            # fused w2@w3
                pl.BlockSpec((HID, tile), lambda j: (0, j)),           # w4: streamed over N
                pl.BlockSpec((1, tile), lambda j: (0, j)),             # b4: streamed over N
            ],
            out_specs=pl.BlockSpec((B, tile), lambda j: (0, j)),       # lane-dense output
        ),
        compiler_params=pltpu.CompilerParams(
            dimension_semantics=("parallel",),
            vmem_limit_bytes=vmem_limit),
        cost_estimate=dec_cost,
    )(h_part, prep["small"], prep["w23"], prep["w4"], prep["b4"])
    return out


# --------------------------------------------------------------------------
# Parameter init (PyTorch nn.Linear default) + pure-JAX reference
# --------------------------------------------------------------------------
def init_params(key, n_input, nz):
    """Linear weights stored [in_features, out_features]; biases/BN params [1, F]."""
    def linear(k, fan_in, fan_out):
        kw, kb = jax.random.split(k)
        bound = 1.0 / jnp.sqrt(float(fan_in))
        w = jax.random.uniform(kw, (fan_in, fan_out), jnp.float32, -bound, bound)
        b = jax.random.uniform(kb, (1, fan_out), jnp.float32, -bound, bound)
        return w, b

    k1, k2, k3, k4 = jax.random.split(key, 4)
    w1, b1 = linear(k1, n_input, HID)
    w2, b2 = linear(k2, HID, nz)
    w3, b3 = linear(k3, nz, HID)
    w4, b4 = linear(k4, HID, n_input)
    return {
        "w1": w1, "b1": b1,
        "g1": jnp.ones((1, HID), jnp.float32), "beta1": jnp.zeros((1, HID), jnp.float32),
        "w2": w2, "b2": b2,
        "w3": w3, "b3": b3,
        "g2": jnp.ones((1, HID), jnp.float32), "beta2": jnp.zeros((1, HID), jnp.float32),
        "w4": w4, "b4": b4,
    }


def _reference_forward(x, p):
    """Pure-JAX reference with the original (un-fused) two middle matmuls."""
    h = x @ p["w1"] + p["b1"]
    mu = h.mean(0, keepdims=True)
    var = ((h - mu) ** 2).mean(0, keepdims=True)
    h = jnp.maximum((h - mu) / jnp.sqrt(var + BN_EPS) * p["g1"] + p["beta1"], 0.0)
    z = h @ p["w2"] + p["b2"]
    d = z @ p["w3"] + p["b3"]
    mu2 = d.mean(0, keepdims=True)
    var2 = ((d - mu2) ** 2).mean(0, keepdims=True)
    d = jnp.maximum((d - mu2) / jnp.sqrt(var2 + BN_EPS) * p["g2"] + p["beta2"], 0.0)
    return d @ p["w4"] + p["b4"]


if __name__ == "__main__":
    key = jax.random.PRNGKey(0)
    cases = [
        # (batch, n_input, nz, force_grid, max_tile)
        (8, 32, 8, False, None),    # tiny: fully-resident fused fast path
        (16, 640, 8, False, None),  # fast path, wider features
        (16, 640, 8, True, 256),    # gridded: 2-way K split + parallel N tiles
        (8, 1000, 6, True, 256),    # gridded, ragged n_input (masked partial tiles)
    ]
    for (batch, n_input, nz, force_grid, max_tile) in cases:
        key, kx, kp = jax.random.split(key, 3)
        x = jax.random.normal(kx, (batch, n_input), jnp.float32)
        params = init_params(kp, n_input, nz)
        prep = prepare_params(params)          # hoisted, once per model

        out = autoencoder_forward(x, prep, force_grid=force_grid, max_tile=max_tile)
        jax.block_until_ready(out)

        ref = _reference_forward(x, params)
        assert out.shape == (batch, n_input), (out.shape, (batch, n_input))
        err = float(jnp.max(jnp.abs(out - ref)))
        assert jnp.allclose(out, ref, atol=1e-4, rtol=1e-4), (
            f"mismatch at B={batch}, n_input={n_input}, force_grid={force_grid}: "
            f"max err {err}")

    print("KERNEL_OK")
</pallas_src>

<mosaic_0001>
module attributes {stable_mosaic.version = 11 : i64} {
  func.func @_fused_kernel(%arg0: memref<8x32xf32, #tpu.memory_space<vmem>>, %arg1: memref<32x16xf32, #tpu.memory_space<vmem>>, %arg2: memref<16x16xf32, #tpu.memory_space<vmem>>, %arg3: memref<16x32xf32, #tpu.memory_space<vmem>>, %arg4: memref<1x32xf32, #tpu.memory_space<vmem>>, %arg5: memref<6x16xf32, #tpu.memory_space<vmem>>, %arg6: memref<8x32xf32, #tpu.memory_space<vmem>>) attributes {dimension_semantics = [], scalar_prefetch = 0 : i64, scratch_operands = 0 : i64, tpu.core_type = #tpu.core_type<tc>} {
    %c0 = arith.constant 0 : index
    %c0_0 = arith.constant 0 : index
    %0 = vector.load %arg5[%c0, %c0_0] : memref<6x16xf32, #tpu.memory_space<vmem>>, vector<6x16xf32>
    %c0_1 = arith.constant 0 : index
    %c0_2 = arith.constant 0 : index
    %1 = vector.load %arg0[%c0_1, %c0_2] : memref<8x32xf32, #tpu.memory_space<vmem>>, vector<8x32xf32>
    %c0_3 = arith.constant 0 : index
    %c0_4 = arith.constant 0 : index
    %2 = vector.load %arg1[%c0_3, %c0_4] : memref<32x16xf32, #tpu.memory_space<vmem>>, vector<32x16xf32>
    %cst = arith.constant dense<0.000000e+00> : vector<8x16xf32>
    %3 = tpu.matmul %1, %2, %cst {dimension_numbers = #tpu.dot_dimension_numbers<[1], [0], [0], [1], [0, 0, 1, 1], [], []>} : vector<8x32xf32>, vector<32x16xf32>, vector<8x16xf32> -> vector<8x16xf32>
    %4 = vector.extract_strided_slice %0 {offsets = [0, 0], sizes = [1, 16], strides = [1, 1]} : vector<6x16xf32> to vector<1x16xf32>
    %5 = vector.broadcast %4 : vector<1x16xf32> to vector<8x16xf32>
    %6 = arith.addf %3, %5 : vector<8x16xf32>
    %cst_5 = arith.constant dense<0.000000e+00> : vector<16xf32>
    %7 = vector.multi_reduction <add>, %6, %cst_5 [0] : vector<8x16xf32> to vector<16xf32>
    %8 = vector.shape_cast %7 : vector<16xf32> to vector<1x16xf32>
    %cst_6 = arith.constant 8.000000e+00 : f32
    %9 = vector.broadcast %cst_6 : f32 to vector<1x16xf32>
    %10 = arith.divf %8, %9 : vector<1x16xf32>
    %11 = vector.broadcast %10 : vector<1x16xf32> to vector<8x16xf32>
    %12 = arith.subf %6, %11 : vector<8x16xf32>
    %13 = vector.broadcast %10 : vector<1x16xf32> to vector<8x16xf32>
    %14 = arith.subf %6, %13 : vector<8x16xf32>
    %15 = arith.mulf %12, %14 : vector<8x16xf32>
    %cst_7 = arith.constant dense<0.000000e+00> : vector<16xf32>
    %16 = vector.multi_reduction <add>, %15, %cst_7 [0] : vector<8x16xf32> to vector<16xf32>
    %17 = vector.shape_cast %16 : vector<16xf32> to vector<1x16xf32>
    %cst_8 = arith.constant 8.000000e+00 : f32
    %18 = vector.broadcast %cst_8 : f32 to vector<1x16xf32>
    %19 = arith.divf %17, %18 : vector<1x16xf32>
    %20 = vector.broadcast %10 : vector<1x16xf32> to vector<8x16xf32>
    %21 = arith.subf %6, %20 : vector<8x16xf32>
    %cst_9 = arith.constant 9.99999974E-6 : f32
    %22 = vector.broadcast %cst_9 : f32 to vector<1x16xf32>
    %23 = arith.addf %19, %22 : vector<1x16xf32>
    %24 = math.rsqrt %23 : vector<1x16xf32>
    %25 = vector.broadcast %24 : vector<1x16xf32> to vector<8x16xf32>
    %26 = arith.mulf %21, %25 : vector<8x16xf32>
    %27 = vector.extract_strided_slice %0 {offsets = [1, 0], sizes = [1, 16], strides = [1, 1]} : vector<6x16xf32> to vector<1x16xf32>
    %28 = vector.broadcast %27 : vector<1x16xf32> to vector<8x16xf32>
    %29 = arith.mulf %26, %28 : vector<8x16xf32>
    %30 = vector.extract_strided_slice %0 {offsets = [2, 0], sizes = [1, 16], strides = [1, 1]} : vector<6x16xf32> to vector<1x16xf32>
    %31 = vector.broadcast %30 : vector<1x16xf32> to vector<8x16xf32>
    %32 = arith.addf %29, %31 : vector<8x16xf32>
    %cst_10 = arith.constant 0.000000e+00 : f32
    %33 = vector.broadcast %cst_10 : f32 to vector<8x16xf32>
    %34 = arith.maximumf %32, %33 : vector<8x16xf32>
    %c0_11 = arith.constant 0 : index
    %c0_12 = arith.constant 0 : index
    %35 = vector.load %arg2[%c0_11, %c0_12] : memref<16x16xf32, #tpu.memory_space<vmem>>, vector<16x16xf32>
    %cst_13 = arith.constant dense<0.000000e+00> : vector<8x16xf32>
    %36 = tpu.matmul %34, %35, %cst_13 {dimension_numbers = #tpu.dot_dimension_numbers<[1], [0], [0], [1], [0, 0, 1, 1], [], []>} : vector<8x16xf32>, vector<16x16xf32>, vector<8x16xf32> -> vector<8x16xf32>
    %37 = vector.extract_strided_slice %0 {offsets = [3, 0], sizes = [1, 16], strides = [1, 1]} : vector<6x16xf32> to vector<1x16xf32>
    %38 = vector.broadcast %37 : vector<1x16xf32> to vector<8x16xf32>
    %39 = arith.addf %36, %38 : vector<8x16xf32>
    %cst_14 = arith.constant dense<0.000000e+00> : vector<16xf32>
    %40 = vector.multi_reduction <add>, %39, %cst_14 [0] : vector<8x16xf32> to vector<16xf32>
    %41 = vector.shape_cast %40 : vector<16xf32> to vector<1x16xf32>
    %cst_15 = arith.constant 8.000000e+00 : f32
    %42 = vector.broadcast %cst_15 : f32 to vector<1x16xf32>
    %43 = arith.divf %41, %42 : vector<1x16xf32>
    %44 = vector.broadcast %43 : vector<1x16xf32> to vector<8x16xf32>
    %45 = arith.subf %39, %44 : vector<8x16xf32>
    %46 = vector.broadcast %43 : vector<1x16xf32> to vector<8x16xf32>
    %47 = arith.subf %39, %46 : vector<8x16xf32>
    %48 = arith.mulf %45, %47 : vector<8x16xf32>
    %cst_16 = arith.constant dense<0.000000e+00> : vector<16xf32>
    %49 = vector.multi_reduction <add>, %48, %cst_16 [0] : vector<8x16xf32> to vector<16xf32>
    %50 = vector.shape_cast %49 : vector<16xf32> to vector<1x16xf32>
    %cst_17 = arith.constant 8.000000e+00 : f32
    %51 = vector.broadcast %cst_17 : f32 to vector<1x16xf32>
    %52 = arith.divf %50, %51 : vector<1x16xf32>
    %53 = vector.broadcast %43 : vector<1x16xf32> to vector<8x16xf32>
    %54 = arith.subf %39, %53 : vector<8x16xf32>
    %cst_18 = arith.constant 9.99999974E-6 : f32
    %55 = vector.broadcast %cst_18 : f32 to vector<1x16xf32>
    %56 = arith.addf %52, %55 : vector<1x16xf32>
    %57 = math.rsqrt %56 : vector<1x16xf32>
    %58 = vector.broadcast %57 : vector<1x16xf32> to vector<8x16xf32>
    %59 = arith.mulf %54, %58 : vector<8x16xf32>
    %60 = vector.extract_strided_slice %0 {offsets = [4, 0], sizes = [1, 16], strides = [1, 1]} : vector<6x16xf32> to vector<1x16xf32>
    %61 = vector.broadcast %60 : vector<1x16xf32> to vector<8x16xf32>
    %62 = arith.mulf %59, %61 : vector<8x16xf32>
    %63 = vector.extract_strided_slice %0 {offsets = [5, 0], sizes = [1, 16], strides = [1, 1]} : vector<6x16xf32> to vector<1x16xf32>
    %64 = vector.broadcast %63 : vector<1x16xf32> to vector<8x16xf32>
    %65 = arith.addf %62, %64 : vector<8x16xf32>
    %cst_19 = arith.constant 0.000000e+00 : f32
    %66 = vector.broadcast %cst_19 : f32 to vector<8x16xf32>
    %67 = arith.maximumf %65, %66 : vector<8x16xf32>
    %c0_20 = arith.constant 0 : index
    %c0_21 = arith.constant 0 : index
    %68 = vector.load %arg3[%c0_20, %c0_21] : memref<16x32xf32, #tpu.memory_space<vmem>>, vector<16x32xf32>
    %cst_22 = arith.constant dense<0.000000e+00> : vector<8x32xf32>
    %69 = tpu.matmul %67, %68, %cst_22 {dimension_numbers = #tpu.dot_dimension_numbers<[1], [0], [0], [1], [0, 0, 1, 1], [], []>} : vector<8x16xf32>, vector<16x32xf32>, vector<8x32xf32> -> vector<8x32xf32>
    %c0_23 = arith.constant 0 : index
    %c0_24 = arith.constant 0 : index
    %70 = vector.load %arg4[%c0_23, %c0_24] : memref<1x32xf32, #tpu.memory_space<vmem>>, vector<1x32xf32>
    %71 = vector.broadcast %70 : vector<1x32xf32> to vector<8x32xf32>
    %72 = arith.addf %69, %71 : vector<8x32xf32>
    %c0_25 = arith.constant 0 : index
    %c0_26 = arith.constant 0 : index
    %73 = vector.load %arg6[%c0_25, %c0_26] : memref<8x32xf32, #tpu.memory_space<vmem>>, vector<8x32xf32>
    tpu.vector_store %arg6[%c0_25, %c0_26], %72 {strides = array<i32>} : memref<8x32xf32, #tpu.memory_space<vmem>>, vector<8x32xf32>,
    return
  }
}

</mosaic_0001>

<bundles_post_ra>
// kernel: autoencoder_forward.1
= control target key start
LH: loop header
LB: loop body
LE: loop exit
PB: predicated region body
PF: predicated region fallthrough
CT: control target
= control target key end

     0   :  { %11 = vsyncpa [#allocation3], 0  ;;  %s375_s0 = inlined_call_operand.vmem [shape: f32[8,32], index: 0, kind: input, shape index: {}]   ;;  %s376_s1 = inlined_call_operand.vmem [shape: f32[32,16], index: 1, kind: input, shape index: {}]   ;;  %s377_s2 = inlined_call_operand.vmem [shape: f32[16,16], index: 2, kind: input, shape index: {}]   ;;  %s378_s3 = inlined_call_operand.vmem [shape: f32[16,32], index: 3, kind: input, shape index: {}]   ;;  %s379_s4 = inlined_call_operand.hbm [shape: f32[1,32], index: 4, kind: input, shape index: {}]   ;;  %s380_s5 = inlined_call_operand.vmem [shape: f32[6,16], index: 5, kind: input, shape index: {}]   ;;  %s381_s6 = inlined_call_operand.hbm [shape: f32[8,32], index: 6, kind: output, shape index: {}]  }
   0x1   :  { %12 = vsyncpa [#allocation4], 0  ;;  %s26_s23 = sshll.u32 %s379_s4, 4  ;;  %s285_s24 = smov [#allocation2]   ;;  %s27_s23 = int_to_ptr.hbm [resolvable:$true] %s26_s23 }
   0x2   :  { %s28_s25 = sshll.u32 %s285_s24, 4  ;;  %s29_s25 = int_to_ptr.vmem [resolvable:$true] %s28_s25 }
   0x3   :  { %31 = dma.hbm_to_vmem [thread:$0]  %s27_s23, 16, %s29_s25, [#allocation3]  }
   0x4   :  { %281 = dma.done.wait [#allocation3], 16  }
   0x5   :  { %282 = vsyncadd [#allocation3], 4294967280  ;;  %v43_v0 = vld [vmem:[%s376_s1 + $0x18] sm:$0xff]  ;;  %v42_v1 = vld [vmem:[%s376_s1 + $0x10] sm:$0xff]  ;;  %vm45_vm0 = vcmask 261120   ;;  %v286_v5 = vmov 8.0  }
   0x6   :  { %61 = vmatpush.msra.mxu0 %v43_v0  ;;  %v41_v2 = vld [vmem:[%s376_s1 + $0x8] sm:$0xff]  ;;  %v40_v3 = vld [vmem:[%s376_s1] sm:$0xff]  ;;  %227 = vrcp.f32 %v286_v5  ;;  %vm69_vm1 = vcmask 130048   ;;  %s210_s20 = sshll.u32 %s381_s6, 4  ;;  %s211_s20 = int_to_ptr.hbm [resolvable:$true] %s210_s20 }
   0x7   :  { %v39_v4 = vld [vmem:[%s375_s0] sm:$0xff]  ;;  %v113_v29 = vld [vmem:[%s377_s2 + $0x8] sm:$0xff] }
   0x8   :  { %62 = vmatpush.msra.mxu0 %v42_v1  ;;  %v345_v7 = vld [vmem:[%s380_s5] sm:$0x3f]  ;;  %132 = vmatpush.msra.mxu1 %v113_v29 }
   0x9   :  { %v44_v8 = vperm.slane %v345_v7, 0  ;;  %v112_v30 = vld [vmem:[%s377_s2] sm:$0xff]  ;;  %v107_v43 = vperm.slane %v345_v7, 1  ;;  %v109_v46 = vperm.slane %v345_v7, 2  ;;  %v114_v50 = vperm.slane %v345_v7, 3 }
   0xa   :  { %63 = vmatpush.msra.mxu0 %v41_v2  ;;  %133 = vmatpush.msra.mxu1 %v112_v30  ;;  %v174_v2 = vld [vmem:[%s378_s3 + $0x8] sm:$0xff] }
   0xb   :  { %196 = vmatpush.msra.mxu2 %v174_v2 }
   0xc   :  { %64 = vmatpush.msra.mxu0 %v40_v3  ;;  %v228_v6 = vpop.eup %227  ;;  %v173_v3 = vld [vmem:[%s378_s3] sm:$0xff]  ;;  %s287_s3 = smov [#allocation5]  }
   0xd   :  { %220 = vmatmul.msk.f32.vlgmr.msra.gmra.mxu0 %vm45_vm0, %v39_v4  ;;  %v78_v9 = vmul.f32 8.0, %v228_v6  ;;  %vm82_vm2 = vweird.f32 %v228_v6  ;;  %197 = vmatpush.msra.mxu2 %v173_v3  ;;  %s208_s17 = sshll.u32 %s287_s3, 4  ;;  %s209_s17 = int_to_ptr.vmem [resolvable:$true] %s208_s17 }
   0xf   :  { %v79_v12 = vsub.f32 1.0, %v78_v9 }
  0x11   :  { %v80_v15 = vmul.f32 %v228_v6, %v79_v12 }
  0x13   :  { %v81_v18 = vadd.f32 %v228_v6, %v80_v15 }
  0x15   :  { %v83_v21 = vsel %vm82_vm2, %v228_v6, %v81_v18 }
  0x8a   :  { %v66_v10 = vpop.f32.mrf.mxu0 }
  0x8b   :  { %v67_v11 = vadd.f32 %v66_v10, %v44_v8 }
  0x8d   :  { %v70_v13 = vsel %vm69_vm1, %v67_v11, 0.0 }
  0x8e   :  { %v71_v14 = vrot.slane %v70_v13, 4 }
  0x90   :  { %v72_v16 = vadd.f32 %v71_v14, %v70_v13 }
  0x92   :  { %v73_v17 = vrot.slane %v72_v16, 2 }
  0x94   :  { %v74_v19 = vadd.f32 %v73_v17, %v72_v16  ;;  %v168_v17 = vperm.slane %v345_v7, 4 }
  0x96   :  { %v75_v20 = vrot.slane %v74_v19, 1 }
  0x98   :  { %v76_v22 = vadd.f32 %v75_v20, %v74_v19  ;;  %v170_v20 = vperm.slane %v345_v7, 5 }
  0x9a   :  { %v84_v23 = vmul.f32 %v83_v21, %v76_v22 }
  0x9c   :  { %v85_v24 = vsub.f32 %v67_v11, %v84_v23 }
  0x9e   :  { %v86_v25 = vmul.f32 %v85_v24, %v85_v24 }
  0xa0   :  { %v87_v26 = vsel %vm69_vm1, %v86_v25, 0.0 }
  0xa1   :  { %v88_v27 = vrot.slane %v87_v26, 4 }
  0xa3   :  { %v89_v28 = vadd.f32 %v88_v27, %v87_v26 }
  0xa5   :  { %v90_v31 = vrot.slane %v89_v28, 2 }
  0xa7   :  { %v91_v32 = vadd.f32 %v90_v31, %v89_v28 }
  0xa9   :  { %v92_v33 = vrot.slane %v91_v32, 1 }
  0xab   :  { %v93_v34 = vadd.f32 %v92_v33, %v91_v32 }
  0xad   :  { %v94_v35 = vmul.f32 %v93_v34, %v83_v21 }
  0xaf   :  { %v95_v36 = vadd.f32 1e-05, %v94_v35 }
  0xb1   :  { %229 = vrsqrt.f32 %v95_v36  ;;  %vm102_vm4 = vweird.f32 %v95_v36 }
  0xb7   :  { %v230_v37 = vpop.eup %229 }
  0xb8   :  { %v97_v38 = vmul.f32 %v230_v37, %v95_v36  ;;  %vm103_vm3 = vweird.f32 %v230_v37 }
  0xb9   :  { %vm104_vm5 = vmor %vm102_vm4, %vm103_vm3 }
  0xba   :  { %v98_v39 = vmul.f32 %v230_v37, %v97_v38 }
  0xbc   :  { %v99_v40 = vmul.f32 0.5, %v98_v39 }
  0xbe   :  { %v100_v41 = vsub.f32 1.5, %v99_v40 }
  0xc0   :  { %v101_v42 = vmul.f32 %v230_v37, %v100_v41 }
  0xc2   :  { %v105_v44 = vsel %vm104_vm5, %v230_v37, %v101_v42 }
  0xc3   :  { %v106_v45 = vmul.f32 %v105_v44, %v85_v24  ;;  %v226_v24 = vld [vmem:[#allocation2] ss:$0 sm:$0xff] }
  0xc5   :  { %v108_v47 = vmul.f32 %v107_v43, %v106_v45 }
  0xc7   :  { %v110_v48 = vadd.f32 %v109_v46, %v108_v47 }
  0xc9   :  { %v111_v49 = vmax.f32 %v110_v48, 0.0 }
  0xcb   :  { %221 = vmatmul.msk.f32.vlgmr.msra.gmra.mxu1 %vm69_vm1, %v111_v49 }
 0x148   :  { %v135_v51 = vpop.f32.mrf.mxu1 }
 0x149   :  { %v136_v52 = vadd.f32 %v135_v51, %v114_v50 }
 0x14b   :  { %v138_v53 = vsel %vm69_vm1, %v136_v52, 0.0 }
 0x14c   :  { %v139_v54 = vrot.slane %v138_v53, 4 }
 0x14e   :  { %v140_v55 = vadd.f32 %v139_v54, %v138_v53 }
 0x150   :  { %v141_v56 = vrot.slane %v140_v55, 2 }
 0x152   :  { %v142_v57 = vadd.f32 %v141_v56, %v140_v55 }
 0x154   :  { %v143_v58 = vrot.slane %v142_v57, 1 }
 0x156   :  { %v144_v59 = vadd.f32 %v143_v58, %v142_v57 }
 0x158   :  { %v145_v60 = vmul.f32 %v144_v59, %v83_v21 }
 0x15a   :  { %v146_v61 = vsub.f32 %v136_v52, %v145_v60 }
 0x15c   :  { %v147_v62 = vmul.f32 %v146_v61, %v146_v61 }
 0x15e   :  { %v148_v63 = vsel %vm69_vm1, %v147_v62, 0.0 }
 0x15f   :  { %v149_v0 = vrot.slane %v148_v63, 4 }
 0x161   :  { %v150_v1 = vadd.f32 %v149_v0, %v148_v63 }
 0x163   :  { %v151_v4 = vrot.slane %v150_v1, 2 }
 0x165   :  { %v152_v5 = vadd.f32 %v151_v4, %v150_v1 }
 0x167   :  { %v153_v6 = vrot.slane %v152_v5, 1 }
 0x169   :  { %v154_v8 = vadd.f32 %v153_v6, %v152_v5 }
 0x16b   :  { %v155_v9 = vmul.f32 %v154_v8, %v83_v21 }
 0x16d   :  { %v156_v10 = vadd.f32 1e-05, %v155_v9 }
 0x16f   :  { %231 = vrsqrt.f32 %v156_v10  ;;  %vm163_vm7 = vweird.f32 %v156_v10 }
 0x175   :  { %v232_v11 = vpop.eup %231 }
 0x176   :  { %v158_v12 = vmul.f32 %v232_v11, %v156_v10  ;;  %vm164_vm6 = vweird.f32 %v232_v11 }
 0x177   :  { %vm165_vm8 = vmor %vm163_vm7, %vm164_vm6 }
 0x178   :  { %v159_v13 = vmul.f32 %v232_v11, %v158_v12 }
 0x17a   :  { %v160_v14 = vmul.f32 0.5, %v159_v13 }
 0x17c   :  { %v161_v15 = vsub.f32 1.5, %v160_v14 }
 0x17e   :  { %v162_v16 = vmul.f32 %v232_v11, %v161_v15 }
 0x180   :  { %v166_v18 = vsel %vm165_vm8, %v232_v11, %v162_v16 }
 0x181   :  { %v167_v19 = vmul.f32 %v166_v18, %v146_v61 }
 0x183   :  { %v169_v22 = vmul.f32 %v168_v17, %v167_v19 }
 0x185   :  { %v171_v23 = vadd.f32 %v170_v20, %v169_v22 }
 0x187   :  { %v172_v21 = vmax.f32 %v171_v23, 0.0 }
 0x189   :  { %222 = vmatmul.msk.f32.vlgmr.msra.gmra.mxu2 %vm69_vm1, %v172_v21 }
 0x20c   :  { %v199_v25 = vpop.f32.mrf.mxu2 }
 0x20d   :  { %v200_v26 = vadd.f32 %v226_v24, %v199_v25 }
 0x20f   :  { %202 = vst.msk [vmem:[#allocation5] sm:$0xff] %vm45_vm0, %v200_v26 }
 0x210   :  { %213 = dma.vmem_to_hbm [thread:$0]  %s209_s17, 128, %s211_s20, [#allocation4]  }
 0x211   :  { %283 = dma.done.wait [#allocation4], 128  }
 0x212   :  { %284 = vsyncadd [#allocation4], 4294967168 }
 0x213   :  { %218 = vsyncpa [#allocation3], 1 }
 0x214   :  { %219 = vsyncpa [#allocation4], 1 }

</bundles_post_ra>
